<compile_context>
chip_gen: v6e
topology: v6e:2x2x1
jax: 0.10.0
libtpu: 0.0.40
codegen_flags: <defaults>
</compile_context>

<pallas_src>
import math
import functools

import jax
import jax.numpy as jnp
from jax.experimental import pallas as pl
from jax.experimental.pallas import tpu as pltpu

_LANE = 128
_SUB = 8


def _round_up(v: int, m: int) -> int:
    return (v + m - 1) // m * m


def _vmem_capacity_bytes() -> int:
    """Physical per-core VMEM (falls back to 128 MiB if the query fails)."""
    try:
        return int(pltpu.get_tpu_info().vmem_capacity_bytes)
    except Exception:
        return 128 * 1024 * 1024


def _layernorm_f32(x, gamma, beta, *, true_dim, needs_mask, eps):
    inv_d = 1.0 / true_dim
    if needs_mask:
        lane = jax.lax.broadcasted_iota(jnp.int32, x.shape, dimension=1)
        valid = lane < true_dim                           # mask out lane padding
        mean = jnp.sum(x, axis=-1, keepdims=True) * inv_d  # padded lanes are zero
        xc = jnp.where(valid, x - mean, 0.0)
    else:
        mean = jnp.sum(x, axis=-1, keepdims=True) * inv_d
        xc = x - mean
    var = jnp.sum(xc * xc, axis=-1, keepdims=True) * inv_d
    xn = xc * jax.lax.rsqrt(var + eps)
    return xn * gamma + beta


def _gelu_f32(h, approximate):
    if approximate:
        # tanh form -> EUP slot (effectively free next to the MXU work).
        return jax.nn.gelu(h, approximate=True)
    # exact erf form, matching torch.nn.GELU() default.
    return 0.5 * h * (1.0 + jax.lax.erf(h * (1.0 / math.sqrt(2.0))))


# ---------------------------------------------------------------------------
# Kernel A: weight-resident plan (single hidden chunk, grid = (row tiles,)).
# ---------------------------------------------------------------------------
def ffn_kernel_single(x_ref, gamma_ref, beta_ref, w1_ref, b1_ref, w2_ref, b2_ref,
                      o_ref, *, true_dim, needs_mask, eps, approximate):
    x = x_ref[...].astype(jnp.float32)
    xn = _layernorm_f32(x, gamma_ref[...].astype(jnp.float32),
                        beta_ref[...].astype(jnp.float32),
                        true_dim=true_dim, needs_mask=needs_mask, eps=eps)
    xn = xn.astype(w1_ref.dtype)                          # MXU-operand dtype
    h = jnp.dot(xn, w1_ref[...], preferred_element_type=jnp.float32)
    h = h + b1_ref[...].astype(jnp.float32)
    h = _gelu_f32(h, approximate)
    # Dropout(p=0.0) is the identity -> no-op.
    y = jnp.dot(h.astype(w2_ref.dtype), w2_ref[...], preferred_element_type=jnp.float32)
    o_ref[...] = (y + b2_ref[...].astype(jnp.float32)).astype(o_ref.dtype)


# ---------------------------------------------------------------------------
# Kernel B: chunked-hidden fallback (grid = (row tiles, hidden chunks)).
# ---------------------------------------------------------------------------
def ffn_kernel_chunked(x_ref, gamma_ref, beta_ref, w1_ref, b1_ref, w2_ref, b2_ref,
                       o_ref, xn_ref, acc_ref, *, true_dim, needs_mask, eps, approximate):
    k = pl.program_id(1)
    nk = pl.num_programs(1)

    @pl.when(k == 0)
    def _():
        x = x_ref[...].astype(jnp.float32)
        xn = _layernorm_f32(x, gamma_ref[...].astype(jnp.float32),
                            beta_ref[...].astype(jnp.float32),
                            true_dim=true_dim, needs_mask=needs_mask, eps=eps)
        xn_ref[...] = xn.astype(xn_ref.dtype)
        acc_ref[...] = jnp.zeros_like(acc_ref)

    h = jnp.dot(xn_ref[...], w1_ref[...], preferred_element_type=jnp.float32)
    h = h + b1_ref[...].astype(jnp.float32)
    h = _gelu_f32(h, approximate)
    acc_ref[...] += jnp.dot(h.astype(w2_ref.dtype), w2_ref[...],
                            preferred_element_type=jnp.float32)

    @pl.when(k == nk - 1)
    def _():
        o_ref[...] = (acc_ref[...] + b2_ref[...].astype(jnp.float32)).astype(o_ref.dtype)


@functools.partial(jax.jit, static_argnames=("tile_m", "hidden_chunk",
                                             "gelu_approximate", "compute_dtype", "eps"))
def feed_forward(x, gamma, beta, w1, b1, w2, b2, *, tile_m=None, hidden_chunk=None,
                 gelu_approximate=False, compute_dtype=None, eps=1e-5):
    """x: (B, N, dim) -> (B, N, dim)."""
    B, N, dim = x.shape
    hidden = w1.shape[1]
    rows = B * N

    xb = jnp.dtype(x.dtype).itemsize
    w_dtype = jnp.dtype(compute_dtype) if compute_dtype is not None else jnp.dtype(w1.dtype)
    wb = w_dtype.itemsize

    dim_p = _round_up(dim, _LANE)
    hid_p = _round_up(hidden, _LANE)
    rows_min = _round_up(rows, _SUB)

    # --- generation-aware VMEM budget (≈48 MiB on v7x, ≈96 MiB on v5e/v6e) ---
    vmem_cap = (_vmem_capacity_bytes() * 3) // 4

    # --- row tiling ---
    if tile_m is None:
        tile_m = 512 if vmem_cap >= (80 << 20) else 256
    tm = min(_round_up(tile_m, _SUB), rows_min)
    # Give the "parallel" row axis at least 2 tiles so v7x megacore can shard it.
    if rows_min >= 2 * _SUB and rows_min // tm < 2:
        tm = _round_up(pl.cdiv(rows_min, 2), _SUB)

    def fits_single(tm_):
        est = (4 * tm_ * dim_p * xb                 # x + out tiles (double-buffered)
               + 2 * dim_p * hid_p * wb             # W1 (counted double-buffered)
               + 2 * hid_p * dim_p * wb             # W2
               + 2 * (hid_p + 3 * dim_p) * wb       # biases / gamma / beta
               + 2 * tm_ * hid_p * 4                # h intermediates (f32)
               + 2 * tm_ * dim_p * 4                # xn / y intermediates (f32)
               + (2 << 20))                         # misc headroom
        return est, est <= vmem_cap

    # --- plan selection: weight-resident single chunk unless it cannot fit ---
    use_chunked = hidden_chunk is not None and _round_up(hidden_chunk, _LANE) < hid_p
    est_single = 0
    if not use_chunked:
        est_single, ok = fits_single(tm)
        while not ok and tm > 64:
            tm = _round_up(max(64, tm // 2), _SUB)
            est_single, ok = fits_single(tm)
        if not ok:
            use_chunked = True
            hidden_chunk = 512

    if use_chunked:
        tk = min(_round_up(hidden_chunk, _LANE), hid_p)
        hid_pad = _round_up(hidden, tk)
    else:
        tk = hid_p
        hid_pad = hid_p

    rows_p = _round_up(rows, tm)
    n_row_tiles = rows_p // tm
    needs_mask = dim_p != dim

    # --- padding (skipped entirely when already aligned: no extra HBM passes) ---
    x2d = x.reshape(rows, dim)
    if rows_p != rows or dim_p != dim:
        x2d = jnp.pad(x2d, ((0, rows_p - rows), (0, dim_p - dim)))

    def pad1(v, n):
        return (v if v.shape[0] == n else jnp.pad(v, (0, n - v.shape[0]))).reshape(1, n)

    gamma_p = pad1(gamma, dim_p)
    beta_p = pad1(beta, dim_p)
    b1_p = pad1(b1, hid_pad)
    b2_p = pad1(b2, dim_p)
    w1_p = w1 if w1.shape == (dim_p, hid_pad) else jnp.pad(
        w1, ((0, dim_p - dim), (0, hid_pad - hidden)))
    w2_p = w2 if w2.shape == (hid_pad, dim_p) else jnp.pad(
        w2, ((0, hid_pad - hidden), (0, dim_p - dim)))
    if compute_dtype is not None:
        w1_p = w1_p.astype(w_dtype)
        w2_p = w2_p.astype(w_dtype)

    common = dict(true_dim=dim, needs_mask=needs_mask, eps=eps,
                  approximate=gelu_approximate)
    weight_bytes = (2 * dim_p * hid_pad + hid_pad + 3 * dim_p) * wb

    if not use_chunked:
        grid = (n_row_tiles,)
        in_specs = [
            pl.BlockSpec((tm, dim_p), lambda i: (i, 0)),          # x row tile
            pl.BlockSpec((1, dim_p), lambda i: (0, 0)),           # gamma
            pl.BlockSpec((1, dim_p), lambda i: (0, 0)),           # beta
            pl.BlockSpec((dim_p, hid_pad), lambda i: (0, 0)),     # W1 (resident)
            pl.BlockSpec((1, hid_pad), lambda i: (0, 0)),         # b1
            pl.BlockSpec((hid_pad, dim_p), lambda i: (0, 0)),     # W2 (resident)
            pl.BlockSpec((1, dim_p), lambda i: (0, 0)),           # b2
        ]
        out_specs = pl.BlockSpec((tm, dim_p), lambda i: (i, 0))
        scratch_shapes = []
        dim_sem = ("parallel",)
        kernel = functools.partial(ffn_kernel_single, **common)
        est_bytes = est_single
        bytes_accessed = 2 * rows_p * dim_p * xb + weight_bytes           # weights once
    else:
        grid = (n_row_tiles, hid_pad // tk)
        in_specs = [
            pl.BlockSpec((tm, dim_p), lambda i, k: (i, 0)),
            pl.BlockSpec((1, dim_p), lambda i, k: (0, 0)),
            pl.BlockSpec((1, dim_p), lambda i, k: (0, 0)),
            pl.BlockSpec((dim_p, tk), lambda i, k: (0, k)),
            pl.BlockSpec((1, tk), lambda i, k: (0, k)),
            pl.BlockSpec((tk, dim_p), lambda i, k: (k, 0)),
            pl.BlockSpec((1, dim_p), lambda i, k: (0, 0)),
        ]
        out_specs = pl.BlockSpec((tm, dim_p), lambda i, k: (i, 0))
        scratch_shapes = [pltpu.VMEM((tm, dim_p), w_dtype),     # cached LayerNorm output
                          pltpu.VMEM((tm, dim_p), jnp.float32)]  # f32 accumulator
        dim_sem = ("parallel", "arbitrary")
        kernel = functools.partial(ffn_kernel_chunked, **common)
        est_bytes = (4 * tm * dim_p * xb
                     + 4 * dim_p * tk * wb
                     + 2 * (tk + 3 * dim_p) * wb
                     + tm * dim_p * (wb + 4)
                     + 4 * tm * tk * 4
                     + (2 << 20))
        # chunked plan re-streams the weights once per row tile
        bytes_accessed = 2 * rows_p * dim_p * xb + weight_bytes * n_row_tiles

    vmem_limit = int(min(vmem_cap, max(32 << 20, int(est_bytes * 1.25))))

    cost = pl.CostEstimate(
        flops=int(4 * rows * dim * hidden),        # two matmuls
        transcendentals=int(rows * hidden),        # erf / tanh
        bytes_accessed=int(bytes_accessed),
    )

    out2d = pl.pallas_call(
        kernel,
        out_shape=jax.ShapeDtypeStruct((rows_p, dim_p), x.dtype),
        grid_spec=pltpu.PrefetchScalarGridSpec(
            num_scalar_prefetch=0,
            grid=grid,
            in_specs=in_specs,
            out_specs=out_specs,
            scratch_shapes=scratch_shapes,
        ),
        compiler_params=pltpu.CompilerParams(
            dimension_semantics=dim_sem,
            vmem_limit_bytes=vmem_limit,
        ),
        cost_estimate=cost,
    )(x2d, gamma_p, beta_p, w1_p, b1_p, w2_p, b2_p)

    if rows_p == rows and dim_p == dim:
        return out2d.reshape(B, N, dim)
    return out2d[:rows, :dim].reshape(B, N, dim)


def init_params(key, dim, hidden_dim, dtype=jnp.float32):
    """Deterministic parameter init (mimics PyTorch Linear default ranges)."""
    k1, k2, k3, k4 = jax.random.split(key, 4)
    gamma = jnp.ones((dim,), dtype)
    beta = jnp.zeros((dim,), dtype)
    lim1 = 1.0 / math.sqrt(dim)
    w1 = jax.random.uniform(k1, (dim, hidden_dim), dtype, -lim1, lim1)
    b1 = jax.random.uniform(k2, (hidden_dim,), dtype, -lim1, lim1)
    lim2 = 1.0 / math.sqrt(hidden_dim)
    w2 = jax.random.uniform(k3, (hidden_dim, dim), dtype, -lim2, lim2)
    b2 = jax.random.uniform(k4, (dim,), dtype, -lim2, lim2)
    return gamma, beta, w1, b1, w2, b2


def reference(x, gamma, beta, w1, b1, w2, b2, approximate=False):
    xf = x.astype(jnp.float32)
    mean = jnp.mean(xf, axis=-1, keepdims=True)
    var = jnp.mean((xf - mean) ** 2, axis=-1, keepdims=True)
    xn = (xf - mean) * jax.lax.rsqrt(var + 1e-5) * gamma + beta
    h = xn @ w1 + b1
    h = jax.nn.gelu(h, approximate=approximate)
    y = h @ w2 + b2
    return y.astype(x.dtype)


if __name__ == "__main__":
    key = jax.random.PRNGKey(0)

    # Case 1: small shapes (B, N, dim) -> exact-GELU, weight-resident single-chunk plan.
    B, N, dim, hidden_dim = 2, 8, 32, 64
    kx, kp, key = jax.random.split(key, 3)
    x = jax.random.normal(kx, (B, N, dim), jnp.float32)
    params = init_params(kp, dim, hidden_dim)
    out = jax.block_until_ready(feed_forward(x, *params))
    ref = reference(x, *params)
    assert out.shape == (B, N, dim)
    assert jnp.allclose(out, ref, atol=1e-4, rtol=1e-4), "mismatch vs JAX reference (case 1)"

    # Case 2: awkward shapes exercising row/lane padding and the chunked-hidden fallback.
    B2, N2, dim2, hidden2 = 3, 5, 48, 320
    kx2, kp2, key = jax.random.split(key, 3)
    x2 = jax.random.normal(kx2, (B2, N2, dim2), jnp.float32)
    params2 = init_params(kp2, dim2, hidden2)
    out2 = jax.block_until_ready(feed_forward(x2, *params2, hidden_chunk=128))
    ref2 = reference(x2, *params2)
    assert out2.shape == (B2, N2, dim2)
    assert jnp.allclose(out2, ref2, atol=1e-4, rtol=1e-4), "mismatch vs JAX reference (case 2)"

    # Case 3: opt-in tanh-approximate GELU (EUP path), checked against a tanh reference.
    out3 = jax.block_until_ready(feed_forward(x, *params, gelu_approximate=True))
    ref3 = reference(x, *params, approximate=True)
    assert jnp.allclose(out3, ref3, atol=1e-4, rtol=1e-4), "mismatch vs JAX reference (case 3)"

    # Case 4: opt-in bf16 MXU operands for f32 models (f32 accumulation, looser tolerance).
    out4 = jax.block_until_ready(feed_forward(x, *params, compute_dtype=jnp.bfloat16))
    assert jnp.allclose(out4, ref, atol=5e-2, rtol=5e-2), "mismatch vs JAX reference (case 4)"

    print("KERNEL_OK")
</pallas_src>

<mosaic_0001>
module attributes {stable_mosaic.version = 11 : i64} {
  func.func @ffn_kernel_single(%arg0: i32, %arg1: memref<8x128xf32, #tpu.memory_space<vmem>>, %arg2: memref<1x128xf32, #tpu.memory_space<vmem>>, %arg3: memref<1x128xf32, #tpu.memory_space<vmem>>, %arg4: memref<128x128xf32, #tpu.memory_space<vmem>>, %arg5: memref<1x128xf32, #tpu.memory_space<vmem>>, %arg6: memref<128x128xf32, #tpu.memory_space<vmem>>, %arg7: memref<1x128xf32, #tpu.memory_space<vmem>>, %arg8: memref<8x128xf32, #tpu.memory_space<vmem>>) attributes {dimension_semantics = [#tpu.dimension_semantics<parallel>], iteration_bounds = array<i64: 2>, scalar_prefetch = 0 : i64, scratch_operands = 0 : i64, tpu.core_type = #tpu.core_type<tc>, window_params = [{transform_indices = @transform_0, window_bounds = array<i64: 8, 128>}, {pipeline_mode = #tpu.pipeline_mode<synchronous>, transform_indices = @transform_1, window_bounds = array<i64: 1, 128>}, {pipeline_mode = #tpu.pipeline_mode<synchronous>, transform_indices = @transform_2, window_bounds = array<i64: 1, 128>}, {pipeline_mode = #tpu.pipeline_mode<synchronous>, transform_indices = @transform_3, window_bounds = array<i64: 128, 128>}, {pipeline_mode = #tpu.pipeline_mode<synchronous>, transform_indices = @transform_4, window_bounds = array<i64: 1, 128>}, {pipeline_mode = #tpu.pipeline_mode<synchronous>, transform_indices = @transform_5, window_bounds = array<i64: 128, 128>}, {pipeline_mode = #tpu.pipeline_mode<synchronous>, transform_indices = @transform_6, window_bounds = array<i64: 1, 128>}, {transform_indices = @transform_7, window_bounds = array<i64: 8, 128>}]} {
    %c0 = arith.constant 0 : index
    %c0_0 = arith.constant 0 : index
    %0 = vector.load %arg1[%c0, %c0_0] : memref<8x128xf32, #tpu.memory_space<vmem>>, vector<8x128xf32>
    %c0_1 = arith.constant 0 : index
    %c0_2 = arith.constant 0 : index
    %1 = vector.load %arg2[%c0_1, %c0_2] : memref<1x128xf32, #tpu.memory_space<vmem>>, vector<1x128xf32>
    %c0_3 = arith.constant 0 : index
    %c0_4 = arith.constant 0 : index
    %2 = vector.load %arg3[%c0_3, %c0_4] : memref<1x128xf32, #tpu.memory_space<vmem>>, vector<1x128xf32>
    %3 = tpu.iota {dimensions = array<i32: 1>} : vector<8x128xi32>
    %c32_i32 = arith.constant 32 : i32
    %4 = vector.broadcast %c32_i32 : i32 to vector<8x128xi32>
    %5 = arith.cmpi slt, %3, %4 : vector<8x128xi32>
    %cst = arith.constant dense<0.000000e+00> : vector<8xf32>
    %6 = vector.multi_reduction <add>, %0, %cst [1] : vector<8x128xf32> to vector<8xf32>
    %7 = vector.shape_cast %6 : vector<8xf32> to vector<8x1xf32>
    %cst_5 = arith.constant 3.125000e-02 : f32
    %8 = vector.broadcast %cst_5 : f32 to vector<8x1xf32>
    %9 = arith.mulf %7, %8 : vector<8x1xf32>
    %10 = vector.broadcast %9 : vector<8x1xf32> to vector<8x128xf32>
    %11 = arith.subf %0, %10 : vector<8x128xf32>
    %cst_6 = arith.constant 0.000000e+00 : f32
    %12 = vector.broadcast %cst_6 : f32 to vector<8x128xf32>
    %13 = arith.select %5, %11, %12 : vector<8x128xi1>, vector<8x128xf32>
    %14 = arith.mulf %13, %13 : vector<8x128xf32>
    %cst_7 = arith.constant dense<0.000000e+00> : vector<8xf32>
    %15 = vector.multi_reduction <add>, %14, %cst_7 [1] : vector<8x128xf32> to vector<8xf32>
    %16 = vector.shape_cast %15 : vector<8xf32> to vector<8x1xf32>
    %cst_8 = arith.constant 3.125000e-02 : f32
    %17 = vector.broadcast %cst_8 : f32 to vector<8x1xf32>
    %18 = arith.mulf %16, %17 : vector<8x1xf32>
    %cst_9 = arith.constant 9.99999974E-6 : f32
    %19 = vector.broadcast %cst_9 : f32 to vector<8x1xf32>
    %20 = arith.addf %18, %19 : vector<8x1xf32>
    %21 = math.rsqrt %20 : vector<8x1xf32>
    %22 = vector.broadcast %21 : vector<8x1xf32> to vector<8x128xf32>
    %23 = arith.mulf %13, %22 : vector<8x128xf32>
    %24 = vector.broadcast %1 : vector<1x128xf32> to vector<8x128xf32>
    %25 = arith.mulf %23, %24 : vector<8x128xf32>
    %26 = vector.broadcast %2 : vector<1x128xf32> to vector<8x128xf32>
    %27 = arith.addf %25, %26 : vector<8x128xf32>
    %c0_10 = arith.constant 0 : index
    %c0_11 = arith.constant 0 : index
    %28 = vector.load %arg4[%c0_10, %c0_11] : memref<128x128xf32, #tpu.memory_space<vmem>>, vector<128x128xf32>
    %cst_12 = arith.constant dense<0.000000e+00> : vector<8x128xf32>
    %29 = tpu.matmul %27, %28, %cst_12 {dimension_numbers = #tpu.dot_dimension_numbers<[1], [0], [0], [1], [0, 0, 1, 1], [], []>} : vector<8x128xf32>, vector<128x128xf32>, vector<8x128xf32> -> vector<8x128xf32>
    %c0_13 = arith.constant 0 : index
    %c0_14 = arith.constant 0 : index
    %30 = vector.load %arg5[%c0_13, %c0_14] : memref<1x128xf32, #tpu.memory_space<vmem>>, vector<1x128xf32>
    %31 = vector.broadcast %30 : vector<1x128xf32> to vector<8x128xf32>
    %32 = arith.addf %29, %31 : vector<8x128xf32>
    %cst_15 = arith.constant 5.000000e-01 : f32
    %33 = vector.broadcast %cst_15 : f32 to vector<8x128xf32>
    %34 = arith.mulf %33, %32 : vector<8x128xf32>
    %cst_16 = arith.constant 0.707106769 : f32
    %35 = vector.broadcast %cst_16 : f32 to vector<8x128xf32>
    %36 = arith.mulf %32, %35 : vector<8x128xf32>
    %37 = math.erf %36 : vector<8x128xf32>
    %cst_17 = arith.constant 1.000000e+00 : f32
    %38 = vector.broadcast %cst_17 : f32 to vector<8x128xf32>
    %39 = arith.addf %38, %37 : vector<8x128xf32>
    %40 = arith.mulf %34, %39 : vector<8x128xf32>
    %c0_18 = arith.constant 0 : index
    %c0_19 = arith.constant 0 : index
    %41 = vector.load %arg6[%c0_18, %c0_19] : memref<128x128xf32, #tpu.memory_space<vmem>>, vector<128x128xf32>
    %cst_20 = arith.constant dense<0.000000e+00> : vector<8x128xf32>
    %42 = tpu.matmul %40, %41, %cst_20 {dimension_numbers = #tpu.dot_dimension_numbers<[1], [0], [0], [1], [0, 0, 1, 1], [], []>} : vector<8x128xf32>, vector<128x128xf32>, vector<8x128xf32> -> vector<8x128xf32>
    %c0_21 = arith.constant 0 : index
    %c0_22 = arith.constant 0 : index
    %43 = vector.load %arg7[%c0_21, %c0_22] : memref<1x128xf32, #tpu.memory_space<vmem>>, vector<1x128xf32>
    %44 = vector.broadcast %43 : vector<1x128xf32> to vector<8x128xf32>
    %45 = arith.addf %42, %44 : vector<8x128xf32>
    %c0_23 = arith.constant 0 : index
    %c0_24 = arith.constant 0 : index
    %46 = vector.load %arg8[%c0_23, %c0_24] : memref<8x128xf32, #tpu.memory_space<vmem>>, vector<8x128xf32>
    tpu.vector_store %arg8[%c0_23, %c0_24], %45 {strides = array<i32>} : memref<8x128xf32, #tpu.memory_space<vmem>>, vector<8x128xf32>,
    return
  }
  func.func @transform_0(%arg0: i32) -> (i32, i32) {
    %c0_i32 = arith.constant 0 : i32
    %c0_i32_0 = arith.constant 0 : i32
    return %arg0, %c0_i32 : i32, i32
  }
  func.func @transform_1(%arg0: i32) -> (i32, i32) {
    %c0_i32 = arith.constant 0 : i32
    %c0_i32_0 = arith.constant 0 : i32
    %c0_i32_1 = arith.constant 0 : i32
    return %c0_i32, %c0_i32_0 : i32, i32
  }
  func.func @transform_2(%arg0: i32) -> (i32, i32) {
    %c0_i32 = arith.constant 0 : i32
    %c0_i32_0 = arith.constant 0 : i32
    %c0_i32_1 = arith.constant 0 : i32
    return %c0_i32, %c0_i32_0 : i32, i32
  }
  func.func @transform_3(%arg0: i32) -> (i32, i32) {
    %c0_i32 = arith.constant 0 : i32
    %c0_i32_0 = arith.constant 0 : i32
    %c0_i32_1 = arith.constant 0 : i32
    return %c0_i32, %c0_i32_0 : i32, i32
  }
  func.func @transform_4(%arg0: i32) -> (i32, i32) {
    %c0_i32 = arith.constant 0 : i32
    %c0_i32_0 = arith.constant 0 : i32
    %c0_i32_1 = arith.constant 0 : i32
    return %c0_i32, %c0_i32_0 : i32, i32
  }
  func.func @transform_5(%arg0: i32) -> (i32, i32) {
    %c0_i32 = arith.constant 0 : i32
    %c0_i32_0 = arith.constant 0 : i32
    %c0_i32_1 = arith.constant 0 : i32
    return %c0_i32, %c0_i32_0 : i32, i32
  }
  func.func @transform_6(%arg0: i32) -> (i32, i32) {
    %c0_i32 = arith.constant 0 : i32
    %c0_i32_0 = arith.constant 0 : i32
    %c0_i32_1 = arith.constant 0 : i32
    return %c0_i32, %c0_i32_0 : i32, i32
  }
  func.func @transform_7(%arg0: i32) -> (i32, i32) {
    %c0_i32 = arith.constant 0 : i32
    %c0_i32_0 = arith.constant 0 : i32
    return %arg0, %c0_i32 : i32, i32
  }
}

</mosaic_0001>

<bundles_post_ra>
// kernel: feed_forward.1
= control target key start
LH: loop header
LB: loop body
LE: loop exit
PB: predicated region body
PF: predicated region fallthrough
CT: control target
= control target key end

     0   :  { %s732_s24 = smov 0   ;;  %s898_s0 = inlined_call_operand.vmem [shape: f32[16,128], index: 0, kind: input, shape index: {}]   ;;  %s899_s1 = inlined_call_operand.vmem [shape: f32[1,128], index: 1, kind: input, shape index: {}]   ;;  %s900_s2 = inlined_call_operand.vmem [shape: f32[1,128], index: 2, kind: input, shape index: {}]   ;;  %s901_s3 = inlined_call_operand.vmem [shape: f32[128,128], index: 3, kind: input, shape index: {}]   ;;  %s902_s4 = inlined_call_operand.vmem [shape: f32[1,128], index: 4, kind: input, shape index: {}]   ;;  %s903_s5 = inlined_call_operand.vmem [shape: f32[128,128], index: 5, kind: input, shape index: {}]   ;;  %s904_s6 = inlined_call_operand.vmem [shape: f32[1,128], index: 6, kind: input, shape index: {}]   ;;  %s905_s7 = inlined_call_operand.vmem [shape: f32[16,128], index: 7, kind: output, shape index: {}]  }
   0x1 LB: > { %s551_s25 = sadd.s32 4294967295, %s688_s24   ;;  %p555_p0 = scmp.ge.s32.totalorder %s688_s24, 1  ;;  %s688_s24 = sphi %s732_s24, %s17_s24  }
   0x2   : > { %p236_p1 = scmp.lt.s32.totalorder %s688_s24, 3 }
   0x4   : > { %p237_p2 = pnand %p555_p0, %p236_p1 }
   0x5   : > { %p266_p3 = scmp.lt.s32.totalorder (!%p237_p2), %s551_s25, 1 }
   0x6   : > { %240 = sbr.rel (%p237_p2) target bundleno = 733 (0x2dd), region = 48 }
   0xb   : > { %s907_s25 = smov (!%p266_p3, %s551_s25), 1  ;;  %v321_v1 = vld [vmem:[%s901_s3 + $0x78] sm:$0xff]  ;;  %v690_v2 = vmov 0.0   ;;  %v320_v3 = vld [vmem:[%s901_s3 + $0x70] sm:$0xff]  ;;  %v319_v4 = vld [vmem:[%s901_s3 + $0x68] sm:$0xff]  ;;  %v277_v6 = vlaneseq  ;;  %vm691_vm1 = vmmov 0  }
   0xc   : > { %s556_s26 = sshll.u32 %s907_s25, 3  ;;  %598 = vmatprep.subr.mxu0 %v690_v2  ;;  %633 = vmatprep.subr.mxu1 %v690_v2  ;;  %v318_v5 = vld [vmem:[%s901_s3 + $0x60] sm:$0xff]  ;;  %v317_v13 = vld [vmem:[%s901_s3 + $0x58] sm:$0xff]  ;;  %v316_v14 = vld [vmem:[%s901_s3 + $0x50] sm:$0xff] }
   0xd   : > { %s269_s29 = scalar_lea.vmem %s898_s0, %s556_s26  ;;  %599 = vmatpush3.msra.mxu0 %v321_v1  ;;  %v278_v7 = vand.u32 127, %v277_v6  ;;  %v315_v15 = vld [vmem:[%s901_s3 + $0x48] sm:$0xff]  ;;  %v314_v16 = vld [vmem:[%s901_s3 + $0x40] sm:$0xff]  ;;  %630 = vmatprep.mubr.msk.f32.mxu0 %vm691_vm1, %v690_v2  ;;  %v313_v17 = vld [vmem:[%s901_s3 + $0x38] sm:$0xff]  ;;  %s273_s21 = scalar_lea.vmem %s905_s7, %s556_s26 }
   0xe   : > { %v274_v0 = vld [vmem:[%s269_s29] sm:$0xff]  ;;  %600 = vmatprep.subr.mxu0 %v690_v2  ;;  %665 = vmatprep.mubr.msk.f32.mxu1 %vm691_vm1, %v690_v2  ;;  %v312_v18 = vld [vmem:[%s901_s3 + $0x30] sm:$0xff]  ;;  %v311_v19 = vld [vmem:[%s901_s3 + $0x28] sm:$0xff] }
   0xf   : > { %280 = vadd.xlane.f32.xlu0 %v274_v0  ;;  %601 = vmatpush3.msra.mxu0 %v320_v3  ;;  %vm279_vm0 = vcmp.lt.s32.totalorder %v278_v7, 32  ;;  %v310_v20 = vld [vmem:[%s901_s3 + $0x20] sm:$0xff]  ;;  %v309_v21 = vld [vmem:[%s901_s3 + $0x18] sm:$0xff]  ;;  %v308_v22 = vld [vmem:[%s901_s3 + $0x10] sm:$0xff] }
  0x10   : > { %602 = vmatprep.subr.mxu0 %v690_v2  ;;  %v307_v23 = vld [vmem:[%s901_s3 + $0x8] sm:$0xff]  ;;  %v306_v24 = vld [vmem:[%s901_s3] sm:$0xff]  ;;  %v419_v25 = vld [vmem:[%s903_s5 + $0x78] sm:$0xff] }
  0x11   : > { %603 = vmatpush3.msra.mxu0 %v319_v4  ;;  %v418_v26 = vld [vmem:[%s903_s5 + $0x70] sm:$0xff]  ;;  %634 = vmatpush3.msra.mxu1 %v419_v25  ;;  %v417_v27 = vld [vmem:[%s903_s5 + $0x68] sm:$0xff]  ;;  %v416_v28 = vld [vmem:[%s903_s5 + $0x60] sm:$0xff] }
  0x12   : > { %604 = vmatprep.subr.mxu0 %v690_v2  ;;  %635 = vmatprep.subr.mxu1 %v690_v2  ;;  %v558_v33 = vld [vmem:[%s899_s1] ss:$0 sm:$0xff]  ;;  %v415_v38 = vld [vmem:[%s903_s5 + $0x58] sm:$0xff]  ;;  %v414_v39 = vld [vmem:[%s903_s5 + $0x50] sm:$0xff] }
  0x13   : > { %605 = vmatpush3.msra.mxu0 %v318_v5  ;;  %636 = vmatpush3.msra.mxu1 %v418_v26  ;;  %v559_v35 = vld [vmem:[%s900_s2] ss:$0 sm:$0xff]  ;;  %v413_v40 = vld [vmem:[%s903_s5 + $0x48] sm:$0xff]  ;;  %v411_v42 = vld [vmem:[%s903_s5 + $0x38] sm:$0xff] }
  0x14   : > { %606 = vmatprep.subr.mxu0 %v690_v2  ;;  %637 = vmatprep.subr.mxu1 %v690_v2  ;;  %v412_v41 = vld [vmem:[%s903_s5 + $0x40] sm:$0xff]  ;;  %v410_v43 = vld [vmem:[%s903_s5 + $0x30] sm:$0xff]  ;;  %v409_v44 = vld [vmem:[%s903_s5 + $0x28] sm:$0xff] }
  0x15   : > { %607 = vmatpush3.msra.mxu0 %v317_v13  ;;  %638 = vmatpush3.msra.mxu1 %v417_v27  ;;  %v408_v45 = vld [vmem:[%s903_s5 + $0x20] sm:$0xff]  ;;  %v407_v46 = vld [vmem:[%s903_s5 + $0x18] sm:$0xff]  ;;  %v406_v47 = vld [vmem:[%s903_s5 + $0x10] sm:$0xff] }
  0x16   : > { %608 = vmatprep.subr.mxu0 %v690_v2  ;;  %639 = vmatprep.subr.mxu1 %v690_v2  ;;  %v405_v48 = vld [vmem:[%s903_s5 + $0x8] sm:$0xff]  ;;  %v404_v49 = vld [vmem:[%s903_s5] sm:$0xff] }
  0x17   : > { %609 = vmatpush3.msra.mxu0 %v316_v14  ;;  %640 = vmatpush3.msra.mxu1 %v416_v28  ;;  %v560_v50 = vld [vmem:[%s902_s4] ss:$0 sm:$0xff] }
  0x18   : > { %610 = vmatprep.subr.mxu0 %v690_v2  ;;  %641 = vmatprep.subr.mxu1 %v690_v2  ;;  %v561_v59 = vld [vmem:[%s904_s6] ss:$0 sm:$0xff] }
  0x19   : > { %611 = vmatpush3.msra.mxu0 %v315_v15  ;;  %642 = vmatpush3.msra.mxu1 %v415_v38 }
  0x1a   : > { %612 = vmatprep.subr.mxu0 %v690_v2  ;;  %643 = vmatprep.subr.mxu1 %v690_v2 }
  0x1b   : > { %613 = vmatpush3.msra.mxu0 %v314_v16  ;;  %644 = vmatpush3.msra.mxu1 %v414_v39 }
  0x1c   : > { %614 = vmatprep.subr.mxu0 %v690_v2  ;;  %645 = vmatprep.subr.mxu1 %v690_v2 }
  0x1d   : > { %615 = vmatpush3.msra.mxu0 %v313_v17  ;;  %646 = vmatpush3.msra.mxu1 %v413_v40 }
  0x1e   : > { %616 = vmatprep.subr.mxu0 %v690_v2  ;;  %647 = vmatprep.subr.mxu1 %v690_v2 }
  0x1f   : > { %617 = vmatpush3.msra.mxu0 %v312_v18  ;;  %648 = vmatpush3.msra.mxu1 %v412_v41 }
  0x20   : > { %618 = vmatprep.subr.mxu0 %v690_v2  ;;  %649 = vmatprep.subr.mxu1 %v690_v2 }
  0x21   : > { %619 = vmatpush3.msra.mxu0 %v311_v19  ;;  %650 = vmatpush3.msra.mxu1 %v411_v42 }
  0x22   : > { %620 = vmatprep.subr.mxu0 %v690_v2  ;;  %651 = vmatprep.subr.mxu1 %v690_v2 }
  0x23   : > { %621 = vmatpush3.msra.mxu0 %v310_v20  ;;  %652 = vmatpush3.msra.mxu1 %v410_v43 }
  0x24   : > { %622 = vmatprep.subr.mxu0 %v690_v2  ;;  %653 = vmatprep.subr.mxu1 %v690_v2 }
  0x25   : > { %623 = vmatpush3.msra.mxu0 %v309_v21  ;;  %654 = vmatpush3.msra.mxu1 %v409_v44 }
  0x26   : > { %624 = vmatprep.subr.mxu0 %v690_v2  ;;  %655 = vmatprep.subr.mxu1 %v690_v2 }
  0x27   : > { %625 = vmatpush3.msra.mxu0 %v308_v22  ;;  %656 = vmatpush3.msra.mxu1 %v408_v45 }
  0x28   : > { %626 = vmatprep.subr.mxu0 %v690_v2  ;;  %657 = vmatprep.subr.mxu1 %v690_v2 }
  0x29   : > { %627 = vmatpush3.msra.mxu0 %v307_v23  ;;  %658 = vmatpush3.msra.mxu1 %v407_v46 }
  0x2a   : > { %628 = vmatprep.subr.mxu0 %v690_v2  ;;  %659 = vmatprep.subr.mxu1 %v690_v2 }
  0x2b   : > { %629 = vmatpush3.msra.mxu0 %v306_v24  ;;  %660 = vmatpush3.msra.mxu1 %v406_v47 }
  0x2c   : > { %661 = vmatprep.subr.mxu1 %v690_v2 }
  0x2d   : > { %662 = vmatpush3.msra.mxu1 %v405_v48 }
  0x2e   : > { %663 = vmatprep.subr.mxu1 %v690_v2 }
  0x2f   : > { %664 = vmatpush3.msra.mxu1 %v404_v49 }
  0x98   : > { %v281_v8 = vpop.xlane.xlu0 %280 }
  0x99   : > { %v282_v9 = vmul.f32 0.03125, %v281_v8 }
  0x9b   : > { %v283_v10 = vsub.f32 %v274_v0, %v282_v9 }
  0x9d   : > { %v284_v11 = vsel %vm279_vm0, %v283_v10, 0.0 }
  0x9e   : > { %v285_v12 = vmul.f32 %v284_v11, %v284_v11 }
  0xa0   : > { %286 = vadd.xlane.f32.xlu0 %v285_v12 }
 0x129   : > { %v287_v29 = vpop.xlane.xlu0 %286 }
 0x12a   : > { %v288_v30 = vmul.f32 0.03125, %v287_v29 }
 0x12c   : > { %v289_v31 = vadd.f32 1e-05, %v288_v30 }
 0x12e   : > { %678 = vrsqrt.f32 %v289_v31 }
 0x13b   : > { %v679_v32 = vpop.eup %678 }
 0x13c   : > { %v291_v34 = vmul.f32 %v679_v32, %v284_v11 }
 0x13e   : > { %v298_v36 = vmul.f32 %v558_v33, %v291_v34 }
 0x140   : > { %v305_v37 = vadd.f32 %v559_v35, %v298_v36 }
 0x142   : > { %631 = vmatmul.mubr.f32.vlgmr.msra.gmra.mxu0 %v305_v37 }
 0x202   : > { %v395_v51 = vpop.f32.mrf.mxu0 }
 0x203   : > { %v396_v52 = vadd.f32 %v560_v50, %v395_v51 }
 0x204   : > { %v632_v53 = vpop.f32.mrf.mxu0 }
 0x205   : > { %v400_v54 = vmul.f32 0.70710677, %v396_v52  ;;  %v399_v56 = vmul.f32 0.5, %v396_v52 }
 0x207   : > { %680 = verf.f32 %v400_v54 }
 0x214   : > { %v681_v55 = vpop.eup %680 }
 0x215   : > { %v402_v57 = vadd.f32 1.0, %v681_v55 }
 0x217   : > { %v403_v58 = vmul.f32 %v402_v57, %v399_v56 }
 0x219   : > { %666 = vmatmul.mubr.f32.vlgmr.msra.gmra.mxu1 %v403_v58 }
 0x2d9   : > { %v493_v60 = vpop.f32.mrf.mxu1 }
 0x2da   : > { %v494_v61 = vadd.f32 %v561_v59, %v493_v60 }
 0x2db   : > { %v667_v62 = vpop.f32.mrf.mxu1 }
 0x2dc   : > { %497 = vst [vmem:[%s273_s21] sm:$0xff] %v494_v61 }
 0x2dd PF: > { %s17_s24 = sadd.s32 1, %s688_s24  }
 0x2de   : > { %p14_p4 = scmp.ge.s32.totalorder %s17_s24, 4  }
 0x2e0   :  { %16 = sbr.rel (!%p14_p4) target bundleno = 1 (0x1), region = 78 }

</bundles_post_ra>
